<compile_context>
chip_gen: v7x
topology: tpu7x:2x2x1
jax: 0.10.0
libtpu: 0.0.40
codegen_flags: <defaults>
</compile_context>

<pallas_src>
import functools

import jax
import jax.numpy as jnp
from jax import lax
from jax.experimental import pallas as pl
from jax.experimental.pallas import tpu as pltpu


_LANE = 128     # lane width (last dim)
_SUBLANE = 8    # f32 sublane width (second-to-last dim)


def _round_up(n, m):
    return ((n + m - 1) // m) * m


def _pad2d(a, rows, cols):
    """Zero-pad a 2-D array up to (rows, cols)."""
    return jnp.pad(a, ((0, rows - a.shape[0]), (0, cols - a.shape[1])))


def _rnn_kernel(x_ref,      # [T*Bp, Ip]  time-major, padded, MXU dtype
                wih_ref,    # [Ip, Hp]    = W_ih^T (padded)
                whh_ref,    # [Hp, Hp]    = W_hh^T (padded)
                b_ref,      # [1, Hp]     = b_ih + b_hh   (f32, padded)
                wfc_ref,    # [Hp, Op]    = W_fc^T (padded)
                bfc_ref,    # [1, Op]     (f32, padded)
                out_ref,    # [Bp, Op]    -> fc(h_T)       (f32)
                h_out_ref,  # [Bp, Hp]    -> final hidden  (f32)
                xw_ref,     # VMEM scratch (T, Bp, Hp)     (f32)
                *, seq_len, batch_pad):
    hidden_pad = whh_ref.shape[-1]

    # ---- Input projection for ALL timesteps (off the recurrent chain) ----
    # One [T*Bp, Ip] x [Ip, Hp] matmul + bias, written to an aligned VMEM
    # scratch so per-step reads are cheap ref loads, not slices of a live value.
    xw = (jnp.dot(x_ref[...], wih_ref[...],
                  preferred_element_type=jnp.float32)
          + b_ref[...])                                    # [T*Bp, Hp] f32
    xw_ref[...] = xw.reshape(seq_len, batch_pad, hidden_pad)

    whh = whh_ref[...]                                     # hoist weight load

    # ---- Recurrence: h carried as an f32 loop value (no scratch round-trip) ----
    def step(t, h):
        pre = xw_ref[t] + jnp.dot(h.astype(whh.dtype), whh,
                                  preferred_element_type=jnp.float32)
        return jnp.tanh(pre)                               # f32 elementwise

    h0 = jnp.zeros((batch_pad, hidden_pad), jnp.float32)
    h = lax.fori_loop(0, seq_len, step, h0,
                      unroll=min(seq_len, 8))              # bounded live ranges

    # ---- Epilogue: lane-dense stores of hidden + fused FC on the last carry ----
    h_out_ref[...] = h
    out_ref[...] = (jnp.dot(h.astype(wfc_ref.dtype), wfc_ref[...],
                            preferred_element_type=jnp.float32)
                    + bfc_ref[...])


def prepare_params(params, mxu_dtype=jnp.bfloat16):
    """One-time weight prep: transpose, bias fuse, lane padding, MXU-dtype cast.

    MXU operands get `mxu_dtype` (bf16 = native MXU rate on v6e/v7x); biases
    stay f32 since all elementwise math in the kernel is f32.
    """
    H, I = params["w_ih"].shape
    O = params["w_fc"].shape[0]
    Ip, Hp, Op = (_round_up(d, _LANE) for d in (I, H, O))

    wih_t = _pad2d(jnp.transpose(params["w_ih"]), Ip, Hp).astype(mxu_dtype)
    whh_t = _pad2d(jnp.transpose(params["w_hh"]), Hp, Hp).astype(mxu_dtype)
    wfc_t = _pad2d(jnp.transpose(params["w_fc"]), Hp, Op).astype(mxu_dtype)
    b = _pad2d((params["b_ih"] + params["b_hh"]).reshape(1, H), 1, Hp).astype(jnp.float32)
    bfc = _pad2d(params["b_fc"].reshape(1, O), 1, Op).astype(jnp.float32)
    return {"wih_t": wih_t, "whh_t": whh_t, "b": b, "wfc_t": wfc_t, "bfc": bfc}


@functools.partial(jax.jit, static_argnames=("hidden_size", "output_size"))
def simple_rnn_forward(x, prepped, *, hidden_size, output_size):
    """x: [B, T, input_size]. Returns (out [B, output_size], hidden [1, B, hidden_size])."""
    B, T, I = x.shape
    Bp = _round_up(max(B, _SUBLANE), _SUBLANE)
    Ip = prepped["wih_t"].shape[0]
    Hp = prepped["whh_t"].shape[0]
    Op = prepped["wfc_t"].shape[1]
    mxu_dtype = prepped["wih_t"].dtype

    # Time-major + pad so step t occupies aligned rows t*Bp:(t+1)*Bp and all
    # lane dims are multiples of 128 (unmasked loads/stores in the kernel).
    # TODO(synk): for long sequences / large batch, stream x over a grid=(T,)
    # axis with a BlockSpec index_map (folding this transpose into the per-step
    # DMA) and add a "parallel" batch-block axis — needed for v7x's 64 MiB VMEM
    # and its 2 TensorCores; at these toy shapes everything fits in one shot.
    x_tm = jnp.transpose(x, (1, 0, 2))                        # [T, B, I]
    x_tm = jnp.pad(x_tm, ((0, 0), (0, Bp - B), (0, Ip - I)))  # [T, Bp, Ip]
    x_flat = x_tm.reshape(T * Bp, Ip).astype(mxu_dtype)

    vmem = pl.BlockSpec(memory_space=pltpu.MemorySpace.VMEM)
    kernel = functools.partial(_rnn_kernel, seq_len=T, batch_pad=Bp)

    out_pad, h_pad = pl.pallas_call(
        kernel,
        out_shape=(
            jax.ShapeDtypeStruct((Bp, Op), jnp.float32),
            jax.ShapeDtypeStruct((Bp, Hp), jnp.float32),
        ),
        in_specs=[vmem] * 6,
        out_specs=(vmem, vmem),
        scratch_shapes=[pltpu.VMEM((T, Bp, Hp), jnp.float32)],
    )(x_flat, prepped["wih_t"], prepped["whh_t"], prepped["b"],
      prepped["wfc_t"], prepped["bfc"])

    out = out_pad[:B, :output_size]
    hidden = h_pad[None, :B, :hidden_size]        # [num_layers=1, B, H]
    return out, hidden


def init_params(key, input_size, hidden_size, output_size):
    """Deterministic parameter init (PyTorch-style uniform(-1/sqrt(H), 1/sqrt(H)))."""
    ks = jax.random.split(key, 6)
    s = 1.0 / jnp.sqrt(hidden_size)
    u = lambda k, shape: jax.random.uniform(k, shape, jnp.float32, -s, s)
    return {
        "w_ih": u(ks[0], (hidden_size, input_size)),
        "w_hh": u(ks[1], (hidden_size, hidden_size)),
        "b_ih": u(ks[2], (hidden_size,)),
        "b_hh": u(ks[3], (hidden_size,)),
        "w_fc": u(ks[4], (output_size, hidden_size)),
        "b_fc": u(ks[5], (output_size,)),
    }


def _reference_forward(x, params):
    """Pure-JAX f32 reference mirroring torch semantics, for a sanity check."""
    w_ih, w_hh = params["w_ih"], params["w_hh"]
    b_ih, b_hh = params["b_ih"], params["b_hh"]
    w_fc, b_fc = params["w_fc"], params["b_fc"]
    B, T, _ = x.shape
    H = w_ih.shape[0]
    h = jnp.zeros((B, H), jnp.float32)
    for t in range(T):
        h = jnp.tanh(x[:, t, :] @ w_ih.T + b_ih + h @ w_hh.T + b_hh)
    out = h @ w_fc.T + b_fc
    return out, h[None]


if __name__ == "__main__":
    # x: [batch=2, seq=8, input_size=16], hidden_size=32, output_size=8
    B, T, INPUT, HIDDEN, OUTPUT = 2, 8, 16, 32, 8

    key = jax.random.PRNGKey(0)
    k_x, k_p = jax.random.split(key)
    x = jax.random.normal(k_x, (B, T, INPUT), jnp.float32)
    params = init_params(k_p, INPUT, HIDDEN, OUTPUT)

    ref_out, ref_hidden = _reference_forward(x, params)

    # --- f32 MXU operands: matches the PyTorch/f32 reference tightly ---
    prepped_f32 = prepare_params(params, mxu_dtype=jnp.float32)
    out32, hid32 = simple_rnn_forward(x, prepped_f32,
                                      hidden_size=HIDDEN, output_size=OUTPUT)
    out32 = jax.block_until_ready(out32)
    hid32 = jax.block_until_ready(hid32)
    assert out32.shape == (B, OUTPUT) and hid32.shape == (1, B, HIDDEN)
    assert jnp.allclose(out32, ref_out, atol=1e-5), "f32 output mismatch"
    assert jnp.allclose(hid32, ref_hidden, atol=1e-5), "f32 hidden mismatch"

    # --- bf16 MXU operands (native MXU rate on v6e/v7x); f32 tanh/bias/carry ---
    prepped_bf16 = prepare_params(params, mxu_dtype=jnp.bfloat16)
    out16, hid16 = simple_rnn_forward(x, prepped_bf16,
                                      hidden_size=HIDDEN, output_size=OUTPUT)
    out16 = jax.block_until_ready(out16)
    hid16 = jax.block_until_ready(hid16)
    assert out16.shape == (B, OUTPUT) and hid16.shape == (1, B, HIDDEN)
    assert jnp.allclose(out16, ref_out, atol=5e-2, rtol=5e-2), "bf16 output mismatch"
    assert jnp.allclose(hid16, ref_hidden, atol=5e-2, rtol=5e-2), "bf16 hidden mismatch"

    print("KERNEL_OK")
</pallas_src>

<mosaic_0001>
module attributes {stable_mosaic.version = 11 : i64} {
  func.func @_rnn_kernel(%arg0: memref<64x128xf32, #tpu.memory_space<vmem>>, %arg1: memref<128x128xf32, #tpu.memory_space<vmem>>, %arg2: memref<128x128xf32, #tpu.memory_space<vmem>>, %arg3: memref<1x128xf32, #tpu.memory_space<vmem>>, %arg4: memref<128x128xf32, #tpu.memory_space<vmem>>, %arg5: memref<1x128xf32, #tpu.memory_space<vmem>>, %arg6: memref<8x128xf32, #tpu.memory_space<vmem>>, %arg7: memref<8x128xf32, #tpu.memory_space<vmem>>, %arg8: memref<8x8x128xf32, #tpu.memory_space<vmem>>) attributes {dimension_semantics = [], scalar_prefetch = 0 : i64, scratch_operands = 1 : i64, tpu.core_type = #tpu.core_type<tc>} {
    %c0 = arith.constant 0 : index
    %c0_0 = arith.constant 0 : index
    %0 = vector.load %arg0[%c0, %c0_0] : memref<64x128xf32, #tpu.memory_space<vmem>>, vector<64x128xf32>
    %c0_1 = arith.constant 0 : index
    %c0_2 = arith.constant 0 : index
    %1 = vector.load %arg1[%c0_1, %c0_2] : memref<128x128xf32, #tpu.memory_space<vmem>>, vector<128x128xf32>
    %cst = arith.constant dense<0.000000e+00> : vector<64x128xf32>
    %2 = tpu.matmul %0, %1, %cst {dimension_numbers = #tpu.dot_dimension_numbers<[1], [0], [0], [1], [0, 0, 1, 1], [], []>} : vector<64x128xf32>, vector<128x128xf32>, vector<64x128xf32> -> vector<64x128xf32>
    %c0_3 = arith.constant 0 : index
    %c0_4 = arith.constant 0 : index
    %3 = vector.load %arg3[%c0_3, %c0_4] : memref<1x128xf32, #tpu.memory_space<vmem>>, vector<1x128xf32>
    %4 = vector.broadcast %3 : vector<1x128xf32> to vector<64x128xf32>
    %5 = arith.addf %2, %4 : vector<64x128xf32>
    %6 = vector.shape_cast %5 : vector<64x128xf32> to vector<8x8x128xf32>
    %c0_5 = arith.constant 0 : index
    %c0_6 = arith.constant 0 : index
    %c0_7 = arith.constant 0 : index
    %7 = vector.load %arg8[%c0_5, %c0_6, %c0_7] : memref<8x8x128xf32, #tpu.memory_space<vmem>>, vector<8x8x128xf32>
    tpu.vector_store %arg8[%c0_5, %c0_6, %c0_7], %6 {strides = array<i32>} : memref<8x8x128xf32, #tpu.memory_space<vmem>>, vector<8x8x128xf32>,
    %c0_8 = arith.constant 0 : index
    %c0_9 = arith.constant 0 : index
    %8 = vector.load %arg2[%c0_8, %c0_9] : memref<128x128xf32, #tpu.memory_space<vmem>>, vector<128x128xf32>
    %cst_10 = arith.constant 0.000000e+00 : f32
    %9 = vector.broadcast %cst_10 : f32 to vector<8x128xf32>
    %c0_i32 = arith.constant 0 : i32
    %10 = arith.index_cast %c0_i32 : i32 to index
    %c0_11 = arith.constant 0 : index
    %c0_12 = arith.constant 0 : index
    %11 = vector.load %arg8[%10, %c0_11, %c0_12] : memref<8x8x128xf32, #tpu.memory_space<vmem>>, vector<1x8x128xf32>
    %12 = vector.shape_cast %11 : vector<1x8x128xf32> to vector<8x128xf32>
    %cst_13 = arith.constant dense<0.000000e+00> : vector<8x128xf32>
    %13 = tpu.matmul %9, %8, %cst_13 {dimension_numbers = #tpu.dot_dimension_numbers<[1], [0], [0], [1], [0, 0, 1, 1], [], []>} : vector<8x128xf32>, vector<128x128xf32>, vector<8x128xf32> -> vector<8x128xf32>
    %14 = arith.addf %12, %13 : vector<8x128xf32>
    %15 = math.tanh %14 : vector<8x128xf32>
    %c1_i32 = arith.constant 1 : i32
    %16 = arith.index_cast %c1_i32 : i32 to index
    %c0_14 = arith.constant 0 : index
    %c0_15 = arith.constant 0 : index
    %17 = vector.load %arg8[%16, %c0_14, %c0_15] : memref<8x8x128xf32, #tpu.memory_space<vmem>>, vector<1x8x128xf32>
    %18 = vector.shape_cast %17 : vector<1x8x128xf32> to vector<8x128xf32>
    %cst_16 = arith.constant dense<0.000000e+00> : vector<8x128xf32>
    %19 = tpu.matmul %15, %8, %cst_16 {dimension_numbers = #tpu.dot_dimension_numbers<[1], [0], [0], [1], [0, 0, 1, 1], [], []>} : vector<8x128xf32>, vector<128x128xf32>, vector<8x128xf32> -> vector<8x128xf32>
    %20 = arith.addf %18, %19 : vector<8x128xf32>
    %21 = math.tanh %20 : vector<8x128xf32>
    %c2_i32 = arith.constant 2 : i32
    %22 = arith.index_cast %c2_i32 : i32 to index
    %c0_17 = arith.constant 0 : index
    %c0_18 = arith.constant 0 : index
    %23 = vector.load %arg8[%22, %c0_17, %c0_18] : memref<8x8x128xf32, #tpu.memory_space<vmem>>, vector<1x8x128xf32>
    %24 = vector.shape_cast %23 : vector<1x8x128xf32> to vector<8x128xf32>
    %cst_19 = arith.constant dense<0.000000e+00> : vector<8x128xf32>
    %25 = tpu.matmul %21, %8, %cst_19 {dimension_numbers = #tpu.dot_dimension_numbers<[1], [0], [0], [1], [0, 0, 1, 1], [], []>} : vector<8x128xf32>, vector<128x128xf32>, vector<8x128xf32> -> vector<8x128xf32>
    %26 = arith.addf %24, %25 : vector<8x128xf32>
    %27 = math.tanh %26 : vector<8x128xf32>
    %c3_i32 = arith.constant 3 : i32
    %28 = arith.index_cast %c3_i32 : i32 to index
    %c0_20 = arith.constant 0 : index
    %c0_21 = arith.constant 0 : index
    %29 = vector.load %arg8[%28, %c0_20, %c0_21] : memref<8x8x128xf32, #tpu.memory_space<vmem>>, vector<1x8x128xf32>
    %30 = vector.shape_cast %29 : vector<1x8x128xf32> to vector<8x128xf32>
    %cst_22 = arith.constant dense<0.000000e+00> : vector<8x128xf32>
    %31 = tpu.matmul %27, %8, %cst_22 {dimension_numbers = #tpu.dot_dimension_numbers<[1], [0], [0], [1], [0, 0, 1, 1], [], []>} : vector<8x128xf32>, vector<128x128xf32>, vector<8x128xf32> -> vector<8x128xf32>
    %32 = arith.addf %30, %31 : vector<8x128xf32>
    %33 = math.tanh %32 : vector<8x128xf32>
    %c4_i32 = arith.constant 4 : i32
    %34 = arith.index_cast %c4_i32 : i32 to index
    %c0_23 = arith.constant 0 : index
    %c0_24 = arith.constant 0 : index
    %35 = vector.load %arg8[%34, %c0_23, %c0_24] : memref<8x8x128xf32, #tpu.memory_space<vmem>>, vector<1x8x128xf32>
    %36 = vector.shape_cast %35 : vector<1x8x128xf32> to vector<8x128xf32>
    %cst_25 = arith.constant dense<0.000000e+00> : vector<8x128xf32>
    %37 = tpu.matmul %33, %8, %cst_25 {dimension_numbers = #tpu.dot_dimension_numbers<[1], [0], [0], [1], [0, 0, 1, 1], [], []>} : vector<8x128xf32>, vector<128x128xf32>, vector<8x128xf32> -> vector<8x128xf32>
    %38 = arith.addf %36, %37 : vector<8x128xf32>
    %39 = math.tanh %38 : vector<8x128xf32>
    %c5_i32 = arith.constant 5 : i32
    %40 = arith.index_cast %c5_i32 : i32 to index
    %c0_26 = arith.constant 0 : index
    %c0_27 = arith.constant 0 : index
    %41 = vector.load %arg8[%40, %c0_26, %c0_27] : memref<8x8x128xf32, #tpu.memory_space<vmem>>, vector<1x8x128xf32>
    %42 = vector.shape_cast %41 : vector<1x8x128xf32> to vector<8x128xf32>
    %cst_28 = arith.constant dense<0.000000e+00> : vector<8x128xf32>
    %43 = tpu.matmul %39, %8, %cst_28 {dimension_numbers = #tpu.dot_dimension_numbers<[1], [0], [0], [1], [0, 0, 1, 1], [], []>} : vector<8x128xf32>, vector<128x128xf32>, vector<8x128xf32> -> vector<8x128xf32>
    %44 = arith.addf %42, %43 : vector<8x128xf32>
    %45 = math.tanh %44 : vector<8x128xf32>
    %c6_i32 = arith.constant 6 : i32
    %46 = arith.index_cast %c6_i32 : i32 to index
    %c0_29 = arith.constant 0 : index
    %c0_30 = arith.constant 0 : index
    %47 = vector.load %arg8[%46, %c0_29, %c0_30] : memref<8x8x128xf32, #tpu.memory_space<vmem>>, vector<1x8x128xf32>
    %48 = vector.shape_cast %47 : vector<1x8x128xf32> to vector<8x128xf32>
    %cst_31 = arith.constant dense<0.000000e+00> : vector<8x128xf32>
    %49 = tpu.matmul %45, %8, %cst_31 {dimension_numbers = #tpu.dot_dimension_numbers<[1], [0], [0], [1], [0, 0, 1, 1], [], []>} : vector<8x128xf32>, vector<128x128xf32>, vector<8x128xf32> -> vector<8x128xf32>
    %50 = arith.addf %48, %49 : vector<8x128xf32>
    %51 = math.tanh %50 : vector<8x128xf32>
    %c7_i32 = arith.constant 7 : i32
    %52 = arith.index_cast %c7_i32 : i32 to index
    %c0_32 = arith.constant 0 : index
    %c0_33 = arith.constant 0 : index
    %53 = vector.load %arg8[%52, %c0_32, %c0_33] : memref<8x8x128xf32, #tpu.memory_space<vmem>>, vector<1x8x128xf32>
    %54 = vector.shape_cast %53 : vector<1x8x128xf32> to vector<8x128xf32>
    %cst_34 = arith.constant dense<0.000000e+00> : vector<8x128xf32>
    %55 = tpu.matmul %51, %8, %cst_34 {dimension_numbers = #tpu.dot_dimension_numbers<[1], [0], [0], [1], [0, 0, 1, 1], [], []>} : vector<8x128xf32>, vector<128x128xf32>, vector<8x128xf32> -> vector<8x128xf32>
    %56 = arith.addf %54, %55 : vector<8x128xf32>
    %57 = math.tanh %56 : vector<8x128xf32>
    %c8_i32 = arith.constant 8 : i32
    %c0_35 = arith.constant 0 : index
    %c0_36 = arith.constant 0 : index
    %58 = vector.load %arg7[%c0_35, %c0_36] : memref<8x128xf32, #tpu.memory_space<vmem>>, vector<8x128xf32>
    tpu.vector_store %arg7[%c0_35, %c0_36], %57 {strides = array<i32>} : memref<8x128xf32, #tpu.memory_space<vmem>>, vector<8x128xf32>,
    %c0_37 = arith.constant 0 : index
    %c0_38 = arith.constant 0 : index
    %59 = vector.load %arg4[%c0_37, %c0_38] : memref<128x128xf32, #tpu.memory_space<vmem>>, vector<128x128xf32>
    %cst_39 = arith.constant dense<0.000000e+00> : vector<8x128xf32>
    %60 = tpu.matmul %57, %59, %cst_39 {dimension_numbers = #tpu.dot_dimension_numbers<[1], [0], [0], [1], [0, 0, 1, 1], [], []>} : vector<8x128xf32>, vector<128x128xf32>, vector<8x128xf32> -> vector<8x128xf32>
    %c0_40 = arith.constant 0 : index
    %c0_41 = arith.constant 0 : index
    %61 = vector.load %arg5[%c0_40, %c0_41] : memref<1x128xf32, #tpu.memory_space<vmem>>, vector<1x128xf32>
    %62 = vector.broadcast %61 : vector<1x128xf32> to vector<8x128xf32>
    %63 = arith.addf %60, %62 : vector<8x128xf32>
    %c0_42 = arith.constant 0 : index
    %c0_43 = arith.constant 0 : index
    %64 = vector.load %arg6[%c0_42, %c0_43] : memref<8x128xf32, #tpu.memory_space<vmem>>, vector<8x128xf32>
    tpu.vector_store %arg6[%c0_42, %c0_43], %63 {strides = array<i32>} : memref<8x128xf32, #tpu.memory_space<vmem>>, vector<8x128xf32>,
    return
  }
}

</mosaic_0001>

<bundles_post_ra>
// kernel: simple_rnn_forward.1
= control target key start
LH: loop header
LB: loop body
LE: loop exit
PB: predicated region body
PF: predicated region fallthrough
CT: control target
= control target key end

     0   :  { %13 = vsyncpa [#allocation4], 0  ;;  %s2114_s0 = inlined_call_operand.vmem [shape: f32[64,128], index: 0, kind: input, shape index: {}]   ;;  %s2115_s1 = inlined_call_operand.vmem [shape: f32[128,128], index: 1, kind: input, shape index: {}]   ;;  %s2116_s2 = inlined_call_operand.hbm [shape: f32[128,128], index: 2, kind: input, shape index: {}]   ;;  %s2117_s3 = inlined_call_operand.vmem [shape: f32[1,128], index: 3, kind: input, shape index: {}]   ;;  %s2118_s4 = inlined_call_operand.hbm [shape: f32[128,128], index: 4, kind: input, shape index: {}]   ;;  %s2119_s5 = inlined_call_operand.vmem [shape: f32[1,128], index: 5, kind: input, shape index: {}]   ;;  %s2120_s6 = inlined_call_operand.vmem [shape: f32[8,128], index: 6, kind: output, shape index: {0}]   ;;  %s2121_s7 = inlined_call_operand.vmem [shape: f32[8,128], index: 7, kind: output, shape index: {1}]  }
   0x1   :  { %14 = vsyncpa [#allocation6], 0  ;;  %s1766_s24 = smov [#allocation3]   ;;  %s1718_s28 = scalar_lea.hbm %s2116_s2, 2048 }
   0x2   :  { %s24_s25 = sshll.u32 %s1766_s24, 4  ;;  %p1719_p0 = scmp.ne.s32.totalorder %s2116_s2, %s1718_s28  ;;  %s25_s25 = int_to_ptr.vmem [resolvable:$true] %s24_s25 }
   0x3   :  { %p1722_p1 = scmp.lt.u32.totalorder %s1718_s28, %s2116_s2 }
   0x5   :  { %p1724_p2 = pnand %p1722_p1, %p1719_p0 }
   0x7   :  { %1727 = shalt.err (!%p1724_p2)
}
   0x8   :  { %s1728_s10 = scalar_lea.vmem %s25_s25, 2048  ;;  %p1733_p4 = scmp.lt.s32.totalorder %s25_s25, %s25_s25 }
   0x9   :  { %p1729_p3 = scmp.ne.s32.totalorder %s25_s25, %s1728_s10  ;;  %p1734_p5 = scmp.lt.s32.totalorder %s1728_s10, %s1728_s10 }
   0xb   :  { %p1735_p6 = por %p1734_p5, %p1733_p4 }
   0xd   :  { %p1736_p7 = pnand %p1735_p6, %p1729_p3 }
   0xf   :  { %1739 = shalt.err (!%p1736_p7)
}
  0x10   :  { %s1767_s11 = smov 128   ;;  %s1768_s12 = smov 8  }
  0x11   :  { %30 = dma.hbm_to_vmem [thread:$0]  %s2116_s2, 2048, %s25_s25, [#allocation4], %s1767_s11, %s1767_s11, %s1768_s12  }
  0x12   :  { %s1769_s15 = smov [#allocation5]   ;;  %s1740_s19 = scalar_lea.hbm %s2118_s4, 2048 }
  0x13   :  { %s38_s16 = sshll.u32 %s1769_s15, 4  ;;  %p1741_p8 = scmp.ne.s32.totalorder %s2118_s4, %s1740_s19  ;;  %s39_s16 = int_to_ptr.vmem [resolvable:$true] %s38_s16 }
  0x14   :  { %p1744_p9 = scmp.lt.u32.totalorder %s1740_s19, %s2118_s4 }
  0x16   :  { %p1746_p10 = pnand %p1744_p9, %p1741_p8 }
  0x18   :  { %1749 = shalt.err (!%p1746_p10)
}
  0x19   :  { %s1750_s24 = scalar_lea.vmem %s39_s16, 2048  ;;  %p1755_p12 = scmp.lt.s32.totalorder %s39_s16, %s39_s16 }
  0x1a   :  { %p1751_p11 = scmp.ne.s32.totalorder %s39_s16, %s1750_s24  ;;  %p1756_p13 = scmp.lt.s32.totalorder %s1750_s24, %s1750_s24 }
  0x1c   :  { %p1757_p0 = por %p1756_p13, %p1755_p12 }
  0x1e   :  { %p1758_p1 = pnand %p1757_p0, %p1751_p11 }
  0x20   :  { %1761 = shalt.err (!%p1758_p1)
}
  0x21   :  { %44 = dma.hbm_to_vmem [thread:$0]  %s2118_s4, 2048, %s39_s16, [#allocation6], %s1767_s11, %s1767_s11, %s1768_s12  }
  0x22   :  { %1762 = dma.done.wait [#allocation4], 2048  }
  0x23   :  { %1763 = vsyncadd [#allocation4], 4294965248 }
  0x24   :  { %1764 = dma.done.wait [#allocation6], 2048  }
  0x25   :  { %1765 = vsyncadd [#allocation6], 4294965248  ;;  %v1770_v0 = vmov 0.0|0.0   ;;  %vm1771_vm0 = vmmov 0   ;;  %v1772_v1 = vmov 0.0   ;;  %v61_v2 = vld [vmem:[%s2115_s1] sm:$0xff] }
  0x26   :  { %1479 = vmatprep.subr.bf16.mxu1 %v1770_v0  ;;  %1164 = vmatprep.mubr.msk.f32.mxu1 %vm1771_vm0, %v1772_v1  ;;  %v62_v3 = vld [vmem:[%s2115_s1 + $0x8] sm:$0xff]  ;;  %v197_v4 = vld [vmem:[#allocation3] sm:$0xff]  ;;  %v63_v7 = vld [vmem:[%s2115_s1 + $0x10] sm:$0xff] }
  0x27   :  { %v1447_v5 = vpack.c.bf16 %v62_v3, %v61_v2  ;;  %v198_v6 = vld [vmem:[#allocation3 + $0x8] sm:$0xff]  ;;  %v64_v8 = vld [vmem:[%s2115_s1 + $0x18] sm:$0xff]  ;;  %v199_v11 = vld [vmem:[#allocation3 + $0x10] sm:$0xff] }
  0x28   :  { %v1852_v9 = vpack.c.bf16 %v198_v6, %v197_v4  ;;  %v1451_v10 = vpack.c.bf16 %v64_v8, %v63_v7  ;;  %v200_v12 = vld [vmem:[#allocation3 + $0x18] sm:$0xff]  ;;  %v65_v13 = vld [vmem:[%s2115_s1 + $0x20] sm:$0xff]  ;;  %v66_v14 = vld [vmem:[%s2115_s1 + $0x28] sm:$0xff] }
  0x29   :  { %1448 = vmatprep.subr.bf16.mxu0 %v1447_v5  ;;  %v1861_v15 = vpack.c.bf16 %v200_v12, %v199_v11  ;;  %v1455_v16 = vpack.c.bf16 %v66_v14, %v65_v13  ;;  %v201_v17 = vld [vmem:[#allocation3 + $0x20] sm:$0xff]  ;;  %v202_v18 = vld [vmem:[#allocation3 + $0x28] sm:$0xff]  ;;  %v67_v19 = vld [vmem:[%s2115_s1 + $0x30] sm:$0xff] }
  0x2a   :  { %1450 = vmatpush3.bf16.msra.mxu0 %v1447_v5  ;;  %1481 = vmatpush3.bf16.msra.mxu1 %v1852_v9  ;;  %v68_v20 = vld [vmem:[%s2115_s1 + $0x38] sm:$0xff]  ;;  %v1871_v21 = vpack.c.bf16 %v202_v18, %v201_v17  ;;  %v203_v23 = vld [vmem:[#allocation3 + $0x30] sm:$0xff]  ;;  %v69_v25 = vld [vmem:[%s2115_s1 + $0x40] sm:$0xff] }
  0x2b   :  { %1452 = vmatprep.subr.bf16.mxu0 %v1451_v10  ;;  %1482 = vmatprep.subr.bf16.mxu1 %v1770_v0  ;;  %v1459_v22 = vpack.c.bf16 %v68_v20, %v67_v19  ;;  %v204_v24 = vld [vmem:[#allocation3 + $0x38] sm:$0xff]  ;;  %v70_v26 = vld [vmem:[%s2115_s1 + $0x48] sm:$0xff]  ;;  %v53_v27 = vld [vmem:[%s2114_s0] sm:$0xff] }
  0x2c   :  { %1120 = vmatprep.mubr.f32.mxu0 %v53_v27  ;;  %v1884_v28 = vpack.c.bf16 %v204_v24, %v203_v23  ;;  %v1463_v29 = vpack.c.bf16 %v70_v26, %v69_v25  ;;  %v205_v30 = vld [vmem:[#allocation3 + $0x40] sm:$0xff]  ;;  %v206_v31 = vld [vmem:[#allocation3 + $0x48] sm:$0xff]  ;;  %v71_v32 = vld [vmem:[%s2115_s1 + $0x50] sm:$0xff] }
  0x2d   :  { %v72_v33 = vld [vmem:[%s2115_s1 + $0x58] sm:$0xff]  ;;  %v1894_v34 = vpack.c.bf16 %v206_v31, %v205_v30  ;;  %v207_v36 = vld [vmem:[#allocation3 + $0x50] sm:$0xff]  ;;  %v73_v38 = vld [vmem:[%s2115_s1 + $0x60] sm:$0xff] }
  0x2e   :  { %1454 = vmatpush3.bf16.msra.mxu0 %v1451_v10  ;;  %1484 = vmatpush3.bf16.msra.mxu1 %v1861_v15  ;;  %v1467_v35 = vpack.c.bf16 %v72_v33, %v71_v32  ;;  %v208_v37 = vld [vmem:[#allocation3 + $0x58] sm:$0xff]  ;;  %v74_v39 = vld [vmem:[%s2115_s1 + $0x68] sm:$0xff]  ;;  %v209_v42 = vld [vmem:[#allocation3 + $0x60] sm:$0xff] }
  0x2f   :  { %1456 = vmatprep.subr.bf16.mxu0 %v1455_v16  ;;  %1485 = vmatprep.subr.bf16.mxu1 %v1770_v0  ;;  %v1904_v40 = vpack.c.bf16 %v208_v37, %v207_v36  ;;  %v1471_v41 = vpack.c.bf16 %v74_v39, %v73_v38  ;;  %v210_v43 = vld [vmem:[#allocation3 + $0x68] sm:$0xff]  ;;  %v75_v44 = vld [vmem:[%s2115_s1 + $0x70] sm:$0xff]  ;;  %v76_v45 = vld [vmem:[%s2115_s1 + $0x78] sm:$0xff] }
  0x30   :  { %v1914_v46 = vpack.c.bf16 %v210_v43, %v209_v42  ;;  %v1475_v47 = vpack.c.bf16 %v76_v45, %v75_v44  ;;  %v211_v48 = vld [vmem:[#allocation3 + $0x70] sm:$0xff]  ;;  %v212_v49 = vld [vmem:[#allocation3 + $0x78] sm:$0xff]  ;;  %v54_v51 = vld [vmem:[%s2114_s0 + $0x8] sm:$0xff] }
  0x31   :  { %v1918_v50 = vpack.c.bf16 %v212_v49, %v211_v48  ;;  %v55_v52 = vld [vmem:[%s2114_s0 + $0x10] sm:$0xff]  ;;  %v56_v53 = vld [vmem:[%s2114_s0 + $0x18] sm:$0xff]  ;;  %v57_v54 = vld [vmem:[%s2114_s0 + $0x20] sm:$0xff] }
  0x32   :  { %1458 = vmatpush3.bf16.msra.mxu0 %v1455_v16  ;;  %1487 = vmatpush3.bf16.msra.mxu1 %v1871_v21  ;;  %v58_v55 = vld [vmem:[%s2114_s0 + $0x28] sm:$0xff]  ;;  %v59_v56 = vld [vmem:[%s2114_s0 + $0x30] sm:$0xff]  ;;  %v60_v57 = vld [vmem:[%s2114_s0 + $0x38] sm:$0xff] }
  0x33   :  { %1460 = vmatprep.subr.bf16.mxu0 %v1459_v22  ;;  %1488 = vmatprep.subr.bf16.mxu1 %v1770_v0  ;;  %v1985_v58 = vld [vmem:[%s2117_s3] ss:$0 sm:$0xff]  ;;  %v806_v36 = vld [vmem:[#allocation5 + $0x8] sm:$0xff]  ;;  %v807_v37 = vld [vmem:[#allocation5 + $0x10] sm:$0xff] }
  0x34   :  { %v808_v39 = vld [vmem:[#allocation5 + $0x18] sm:$0xff]  ;;  %v810_v42 = vld [vmem:[#allocation5 + $0x28] sm:$0xff]  ;;  %v811_v44 = vld [vmem:[#allocation5 + $0x30] sm:$0xff] }
  0x35   :  { %v812_v45 = vld [vmem:[#allocation5 + $0x38] sm:$0xff] }
  0x36   :  { %1462 = vmatpush3.bf16.msra.mxu0 %v1459_v22  ;;  %1490 = vmatpush3.bf16.msra.mxu1 %v1884_v28 }
  0x37   :  { %1464 = vmatprep.subr.bf16.mxu0 %v1463_v29  ;;  %1491 = vmatprep.subr.bf16.mxu1 %v1770_v0 }
  0x3a   :  { %1466 = vmatpush3.bf16.msra.mxu0 %v1463_v29  ;;  %1493 = vmatpush3.bf16.msra.mxu1 %v1894_v34 }
  0x3b   :  { %1468 = vmatprep.subr.bf16.mxu0 %v1467_v35  ;;  %1494 = vmatprep.subr.bf16.mxu1 %v1770_v0 }
  0x3e   :  { %1470 = vmatpush3.bf16.msra.mxu0 %v1467_v35  ;;  %1496 = vmatpush3.bf16.msra.mxu1 %v1904_v40  ;;  %v805_v35 = vld [vmem:[#allocation5] sm:$0xff] }
  0x3f   :  { %1472 = vmatprep.subr.bf16.mxu0 %v1471_v41  ;;  %1497 = vmatprep.subr.bf16.mxu1 %v1770_v0  ;;  %v1672_v38 = vpack.c.bf16 %v806_v36, %v805_v35 }
  0x42   :  { %1474 = vmatpush3.bf16.msra.mxu0 %v1471_v41  ;;  %1499 = vmatpush3.bf16.msra.mxu1 %v1914_v46  ;;  %v809_v41 = vld [vmem:[#allocation5 + $0x20] sm:$0xff] }
  0x43   :  { %1476 = vmatprep.subr.bf16.mxu0 %v1475_v47  ;;  %1500 = vmatprep.subr.bf16.mxu1 %v1770_v0  ;;  %v1678_v43 = vpack.c.bf16 %v810_v42, %v809_v41 }
  0x46   :  { %1478 = vmatpush3.bf16.msra.mxu0 %v1475_v47  ;;  %1502 = vmatpush3.bf16.msra.mxu1 %v1918_v50  ;;  %v814_v47 = vld [vmem:[#allocation5 + $0x48] sm:$0xff] }
  0x47   :  { %1503 = vmatprep.subr.bf16.mxu0 %v1770_v0  ;;  %1527 = vmatprep.subr.bf16.mxu1 %v1770_v0 }
  0x49   :  { %1121 = vmatmul.mubr.f32.vlgmr.msra.gmra.mrb[0].mxu0 %v54_v51  ;;  %1165 = vmatmul.mubr.f32.vlgmr.msra.gmra.mrb[0].mxu1 %v1772_v1 }
  0x4a   :  { %1505 = vmatpush3.bf16.msra.mxu0 %v1852_v9  ;;  %1529 = vmatpush3.bf16.msra.mxu1 %v1852_v9 }
  0x4b   :  { %1506 = vmatprep.subr.bf16.mxu0 %v1770_v0  ;;  %1530 = vmatprep.subr.bf16.mxu1 %v1770_v0 }
  0x4c   :  { %1234 = vmatprep.mubr.msk.f32.mxu1 %vm1771_vm0, %v1772_v1  ;;  %1123 = vmatprep.mubr.f32.mxu0 %v55_v52 }
  0x4d   :  { %1124 = vmatmul.mubr.f32.gmra.mrb[2].mxu0 %v56_v53 }
  0x4e   :  { %1508 = vmatpush3.bf16.msra.mxu0 %v1861_v15  ;;  %1532 = vmatpush3.bf16.msra.mxu1 %v1861_v15 }
  0x4f   :  { %1509 = vmatprep.subr.bf16.mxu0 %v1770_v0  ;;  %1533 = vmatprep.subr.bf16.mxu1 %v1770_v0 }
  0x50   :  { %1126 = vmatprep.mubr.f32.mxu0 %v57_v54  ;;  %v815_v54 = vld [vmem:[#allocation5 + $0x50] sm:$0xff] }
  0x51   :  { %1127 = vmatmul.mubr.f32.gmra.mrb[4].mxu0 %v58_v55  ;;  %v816_v55 = vld [vmem:[#allocation5 + $0x58] sm:$0xff] }
  0x52   :  { %1511 = vmatpush3.bf16.msra.mxu0 %v1871_v21  ;;  %1535 = vmatpush3.bf16.msra.mxu1 %v1871_v21 }
  0x53   :  { %1512 = vmatprep.subr.bf16.mxu0 %v1770_v0  ;;  %1536 = vmatprep.subr.bf16.mxu1 %v1770_v0 }
  0x54   :  { %1129 = vmatprep.mubr.f32.mxu0 %v59_v56  ;;  %v1687_v56 = vpack.c.bf16 %v816_v55, %v815_v54 }
  0x55   :  { %1130 = vmatmul.mubr.f32.gmra.mrb[6].mxu0 %v60_v57  ;;  %v817_v57 = vld [vmem:[#allocation5 + $0x60] sm:$0xff] }
  0x56   :  { %1514 = vmatpush3.bf16.msra.mxu0 %v1884_v28  ;;  %1538 = vmatpush3.bf16.msra.mxu1 %v1884_v28 }
  0x57   :  { %1515 = vmatprep.subr.bf16.mxu0 %v1770_v0  ;;  %1539 = vmatprep.subr.bf16.mxu1 %v1770_v0 }
  0x58   :  { %1199 = vmatprep.mubr.msk.f32.mxu0 %vm1771_vm0, %v1772_v1 }
  0x5a   :  { %1517 = vmatpush3.bf16.msra.mxu0 %v1894_v34  ;;  %1541 = vmatpush3.bf16.msra.mxu1 %v1894_v34 }
  0x5b   :  { %1518 = vmatprep.subr.bf16.mxu0 %v1770_v0  ;;  %1542 = vmatprep.subr.bf16.mxu1 %v1770_v0 }
  0x5e   :  { %1520 = vmatpush3.bf16.msra.mxu0 %v1904_v40  ;;  %1544 = vmatpush3.bf16.msra.mxu1 %v1904_v40 }
  0x5f   :  { %1521 = vmatprep.subr.bf16.mxu0 %v1770_v0  ;;  %1545 = vmatprep.subr.bf16.mxu1 %v1770_v0 }
  0x62   :  { %1523 = vmatpush3.bf16.msra.mxu0 %v1914_v46  ;;  %1547 = vmatpush3.bf16.msra.mxu1 %v1914_v46 }
  0x63   :  { %1524 = vmatprep.subr.bf16.mxu0 %v1770_v0  ;;  %1548 = vmatprep.subr.bf16.mxu1 %v1770_v0 }
  0x66   :  { %1526 = vmatpush3.bf16.msra.mxu0 %v1918_v50  ;;  %1550 = vmatpush3.bf16.msra.mxu1 %v1918_v50 }
  0x67   :  { %1551 = vmatprep.subr.bf16.mxu0 %v1770_v0  ;;  %1575 = vmatprep.subr.bf16.mxu1 %v1770_v0 }
 0x11c   :  { %v1122_v59 = vpop.f32.mrb[0].mxu0  ;;  %v280_v60 = vpop.f32.mrb[0].mxu1 }
 0x11d   :  { %v150_v61 = vpop.f32.mrb[1].mxu0  ;;  %v1166_v62 = vpop.f32.mrb[1].mxu1  ;;  %v156_v11 = vadd.f32 %v1122_v59, %v1985_v58  ;;  %v818_v59 = vld [vmem:[#allocation5 + $0x68] sm:$0xff] }
 0x11e   :  { %v151_v63 = vadd.f32 %v1985_v58, %v150_v61  ;;  %v819_v61 = vld [vmem:[#allocation5 + $0x70] sm:$0xff]  ;;  %v820_v62 = vld [vmem:[#allocation5 + $0x78] sm:$0xff] }
 0x120   :  { %v284_v2 = vadd.f32 %v280_v60, %v151_v63  ;;  %v1125_v4 = vpop.f32.mrb[2].mxu0  ;;  %v1690_v60 = vpack.c.bf16 %v818_v59, %v817_v57  ;;  %v1693_v63 = vpack.c.bf16 %v820_v62, %v819_v61 }
 0x121   :  { %v160_v5 = vpop.f32.mrb[3].mxu0  ;;  %v166_v23 = vadd.f32 %v1125_v4, %v1985_v58 }
 0x122   :  { %1702 = vtanh.f32 %v284_v2  ;;  %v161_v17 = vadd.f32 %v1985_v58, %v160_v5 }
 0x124   :  { %v2006_v6 = vpop.f32.mrb[4].mxu0 }
 0x125   :  { %v2008_v7 = vpop.f32.mrb[5].mxu0 }
 0x126   :  { %v171_v29 = vadd.f32 %v1985_v58, %v2008_v7 }
 0x128   :  { %v2010_v8 = vpop.f32.mrb[6].mxu0 }
 0x129   :  { %v2012_v10 = vpop.f32.mrb[7].mxu0  ;;  %v186_v2 = vadd.f32 %v2010_v8, %v1985_v58 }
 0x12a   :  { %v181_v49 = vadd.f32 %v1985_v58, %v2012_v10 }
 0x12c   :  { %v1703_v3 = vpop.eup %1702 }
 0x12d   :  { %1200 = vmatmul.mubr.f32.vlgmr.msra.gmra.mrb[8].mxu0 %v1703_v3 }
 0x12e   :  { %1553 = vmatpush3.bf16.msra.mxu0 %v1852_v9  ;;  %1269 = vmatprep.mubr.msk.f32.mxu0 %vm1771_vm0, %v1772_v1 }
 0x12f   :  { %1554 = vmatprep.subr.bf16.mxu0 %v1770_v0 }
 0x132   :  { %1556 = vmatpush3.bf16.msra.mxu0 %v1861_v15 }
 0x133   :  { %1557 = vmatprep.subr.bf16.mxu0 %v1770_v0 }
 0x136   :  { %1559 = vmatpush3.bf16.msra.mxu0 %v1871_v21 }
 0x137   :  { %1560 = vmatprep.subr.bf16.mxu0 %v1770_v0 }
 0x13a   :  { %1562 = vmatpush3.bf16.msra.mxu0 %v1884_v28 }
 0x13b   :  { %1563 = vmatprep.subr.bf16.mxu0 %v1770_v0 }
 0x13e   :  { %1565 = vmatpush3.bf16.msra.mxu0 %v1894_v34 }
 0x13f   :  { %1566 = vmatprep.subr.bf16.mxu0 %v1770_v0 }
 0x142   :  { %1568 = vmatpush3.bf16.msra.mxu0 %v1904_v40 }
 0x143   :  { %1569 = vmatprep.subr.bf16.mxu0 %v1770_v0 }
 0x146   :  { %1571 = vmatpush3.bf16.msra.mxu0 %v1914_v46 }
 0x147   :  { %1572 = vmatprep.subr.bf16.mxu0 %v1770_v0 }
 0x14a   :  { %1574 = vmatpush3.bf16.msra.mxu0 %v1918_v50 }
 0x14b   :  { %1599 = vmatprep.subr.bf16.mxu0 %v1770_v0 }
 0x200   :  { %v354_v12 = vpop.f32.mrb[8].mxu0 }
 0x201   :  { %v358_v13 = vadd.f32 %v354_v12, %v156_v11  ;;  %v1201_v14 = vpop.f32.mrb[9].mxu0 }
 0x203   :  { %1704 = vtanh.f32 %v358_v13 }
 0x20d   :  { %v1705_v16 = vpop.eup %1704 }
 0x20e   :  { %1235 = vmatmul.mubr.f32.vlgmr.msra.gmra.mrb[2].mxu1 %v1705_v16 }
 0x20f   :  { %1577 = vmatpush3.bf16.msra.mxu1 %v1852_v9  ;;  %1304 = vmatprep.mubr.msk.f32.mxu1 %vm1771_vm0, %v1772_v1 }
 0x210   :  { %1578 = vmatprep.subr.bf16.mxu1 %v1770_v0 }
 0x213   :  { %1580 = vmatpush3.bf16.msra.mxu1 %v1861_v15 }
 0x214   :  { %1581 = vmatprep.subr.bf16.mxu1 %v1770_v0 }
 0x217   :  { %1583 = vmatpush3.bf16.msra.mxu1 %v1871_v21 }
 0x218   :  { %1584 = vmatprep.subr.bf16.mxu1 %v1770_v0 }
 0x21b   :  { %1586 = vmatpush3.bf16.msra.mxu1 %v1884_v28 }
 0x21c   :  { %1587 = vmatprep.subr.bf16.mxu1 %v1770_v0 }
 0x21f   :  { %1589 = vmatpush3.bf16.msra.mxu1 %v1894_v34 }
 0x220   :  { %1590 = vmatprep.subr.bf16.mxu1 %v1770_v0 }
 0x223   :  { %1592 = vmatpush3.bf16.msra.mxu1 %v1904_v40 }
 0x224   :  { %1593 = vmatprep.subr.bf16.mxu1 %v1770_v0 }
 0x227   :  { %1595 = vmatpush3.bf16.msra.mxu1 %v1914_v46 }
 0x228   :  { %1596 = vmatprep.subr.bf16.mxu1 %v1770_v0 }
 0x22b   :  { %1598 = vmatpush3.bf16.msra.mxu1 %v1918_v50 }
 0x22c   :  { %1623 = vmatprep.subr.bf16.mxu1 %v1770_v0 }
 0x2e1   :  { %v428_v18 = vpop.f32.mrb[2].mxu1 }
 0x2e2   :  { %v432_v19 = vadd.f32 %v428_v18, %v161_v17  ;;  %v1236_v20 = vpop.f32.mrb[3].mxu1 }
 0x2e4   :  { %1706 = vtanh.f32 %v432_v19 }
 0x2ee   :  { %v1707_v22 = vpop.eup %1706 }
 0x2ef   :  { %1270 = vmatmul.mubr.f32.vlgmr.msra.gmra.mrb[10].mxu0 %v1707_v22 }
 0x2f0   :  { %1601 = vmatpush3.bf16.msra.mxu0 %v1852_v9  ;;  %1339 = vmatprep.mubr.msk.f32.mxu0 %vm1771_vm0, %v1772_v1 }
 0x2f1   :  { %1602 = vmatprep.subr.bf16.mxu0 %v1770_v0 }
 0x2f4   :  { %1604 = vmatpush3.bf16.msra.mxu0 %v1861_v15 }
 0x2f5   :  { %1605 = vmatprep.subr.bf16.mxu0 %v1770_v0 }
 0x2f8   :  { %1607 = vmatpush3.bf16.msra.mxu0 %v1871_v21 }
 0x2f9   :  { %1608 = vmatprep.subr.bf16.mxu0 %v1770_v0 }
 0x2fc   :  { %1610 = vmatpush3.bf16.msra.mxu0 %v1884_v28 }
 0x2fd   :  { %1611 = vmatprep.subr.bf16.mxu0 %v1770_v0 }
 0x300   :  { %1613 = vmatpush3.bf16.msra.mxu0 %v1894_v34 }
 0x301   :  { %1614 = vmatprep.subr.bf16.mxu0 %v1770_v0 }
 0x304   :  { %1616 = vmatpush3.bf16.msra.mxu0 %v1904_v40 }
 0x305   :  { %1617 = vmatprep.subr.bf16.mxu0 %v1770_v0 }
 0x308   :  { %1619 = vmatpush3.bf16.msra.mxu0 %v1914_v46 }
 0x309   :  { %1620 = vmatprep.subr.bf16.mxu0 %v1770_v0 }
 0x30c   :  { %1622 = vmatpush3.bf16.msra.mxu0 %v1918_v50 }
 0x30d   :  { %1647 = vmatprep.subr.bf16.mxu0 %v1770_v0 }
 0x3c2   :  { %v502_v24 = vpop.f32.mrb[10].mxu0 }
 0x3c3   :  { %v506_v25 = vadd.f32 %v502_v24, %v166_v23  ;;  %v1271_v26 = vpop.f32.mrb[11].mxu0 }
 0x3c5   :  { %1708 = vtanh.f32 %v506_v25 }
 0x3cf   :  { %v1709_v27 = vpop.eup %1708 }
 0x3d0   :  { %1305 = vmatmul.mubr.f32.vlgmr.msra.gmra.mrb[4].mxu1 %v1709_v27 }
 0x3d1   :  { %1625 = vmatpush3.bf16.msra.mxu1 %v1852_v9  ;;  %1374 = vmatprep.mubr.msk.f32.mxu1 %vm1771_vm0, %v1772_v1 }
 0x3d2   :  { %1626 = vmatprep.subr.bf16.mxu1 %v1770_v0 }
 0x3d5   :  { %1628 = vmatpush3.bf16.msra.mxu1 %v1861_v15 }
 0x3d6   :  { %1629 = vmatprep.subr.bf16.mxu1 %v1770_v0 }
 0x3d9   :  { %1631 = vmatpush3.bf16.msra.mxu1 %v1871_v21 }
 0x3da   :  { %1632 = vmatprep.subr.bf16.mxu1 %v1770_v0 }
 0x3dd   :  { %1634 = vmatpush3.bf16.msra.mxu1 %v1884_v28 }
 0x3de   :  { %1635 = vmatprep.subr.bf16.mxu1 %v1770_v0 }
 0x3e1   :  { %1637 = vmatpush3.bf16.msra.mxu1 %v1894_v34 }
 0x3e2   :  { %1638 = vmatprep.subr.bf16.mxu1 %v1770_v0 }
 0x3e5   :  { %1640 = vmatpush3.bf16.msra.mxu1 %v1904_v40 }
 0x3e6   :  { %1641 = vmatprep.subr.bf16.mxu1 %v1770_v0 }
 0x3e9   :  { %1643 = vmatpush3.bf16.msra.mxu1 %v1914_v46 }
 0x3ea   :  { %1644 = vmatprep.subr.bf16.mxu1 %v1770_v0 }
 0x3ed   :  { %1646 = vmatpush3.bf16.msra.mxu1 %v1918_v50 }
 0x3ee   :  { %1671 = vmatprep.subr.bf16.mxu1 %v1770_v0 }
 0x4a3   :  { %v576_v30 = vpop.f32.mrb[4].mxu1 }
 0x4a4   :  { %v580_v31 = vadd.f32 %v576_v30, %v171_v29  ;;  %v1306_v32 = vpop.f32.mrb[5].mxu1 }
 0x4a6   :  { %1710 = vtanh.f32 %v580_v31 }
 0x4b0   :  { %v1711_v33 = vpop.eup %1710 }
 0x4b1   :  { %1340 = vmatmul.mubr.f32.vlgmr.msra.gmra.mrb[12].mxu0 %v1711_v33 }
 0x4b2   :  { %1649 = vmatpush3.bf16.msra.mxu0 %v1852_v9  ;;  %1409 = vmatprep.mubr.msk.f32.mxu0 %vm1771_vm0, %v1772_v1  ;;  %v176_v9 = vadd.f32 %v2006_v6, %v1985_v58 }
 0x4b3   :  { %1650 = vmatprep.subr.bf16.mxu0 %v1770_v0 }
 0x4b6   :  { %1652 = vmatpush3.bf16.msra.mxu0 %v1861_v15 }
 0x4b7   :  { %1653 = vmatprep.subr.bf16.mxu0 %v1770_v0 }
 0x4ba   :  { %1655 = vmatpush3.bf16.msra.mxu0 %v1871_v21 }
 0x4bb   :  { %1656 = vmatprep.subr.bf16.mxu0 %v1770_v0 }
 0x4be   :  { %1658 = vmatpush3.bf16.msra.mxu0 %v1884_v28 }
 0x4bf   :  { %1659 = vmatprep.subr.bf16.mxu0 %v1770_v0 }
 0x4c2   :  { %1661 = vmatpush3.bf16.msra.mxu0 %v1894_v34 }
 0x4c3   :  { %1662 = vmatprep.subr.bf16.mxu0 %v1770_v0 }
 0x4c6   :  { %1664 = vmatpush3.bf16.msra.mxu0 %v1904_v40  ;;  %v1675_v40 = vpack.c.bf16 %v808_v39, %v807_v37 }
 0x4c7   :  { %1665 = vmatprep.subr.bf16.mxu0 %v1770_v0 }
 0x4ca   :  { %1667 = vmatpush3.bf16.msra.mxu0 %v1914_v46  ;;  %v1681_v46 = vpack.c.bf16 %v812_v45, %v811_v44 }
 0x4cb   :  { %1668 = vmatprep.subr.bf16.mxu0 %v1770_v0 }
 0x4ce   :  { %1670 = vmatpush3.bf16.msra.mxu0 %v1918_v50 }
 0x584   :  { %v650_v15 = vpop.f32.mrb[12].mxu0 }
 0x585   :  { %v654_v21 = vadd.f32 %v650_v15, %v176_v9  ;;  %v1341_v28 = vpop.f32.mrb[13].mxu0 }
 0x587   :  { %1712 = vtanh.f32 %v654_v21 }
 0x591   :  { %v1713_v34 = vpop.eup %1712 }
 0x592   :  { %1375 = vmatmul.mubr.f32.vlgmr.msra.gmra.mrb[6].mxu1 %v1713_v34 }
 0x593   :  { %1444 = vmatprep.mubr.msk.f32.mxu1 %vm1771_vm0, %v1772_v1  ;;  %1673 = vmatpush3.bf16.msra.mxu1 %v1672_v38  ;;  %v813_v1 = vld [vmem:[#allocation5 + $0x40] sm:$0xff] }
 0x594   :  { %1674 = vmatprep.subr.bf16.mxu1 %v1770_v0  ;;  %v1684_v48 = vpack.c.bf16 %v814_v47, %v813_v1 }
 0x597   :  { %1676 = vmatpush3.bf16.msra.mxu1 %v1675_v40 }
 0x598   :  { %1677 = vmatprep.subr.bf16.mxu1 %v1770_v0 }
 0x59b   :  { %1679 = vmatpush3.bf16.msra.mxu1 %v1678_v43 }
 0x59c   :  { %1680 = vmatprep.subr.bf16.mxu1 %v1770_v0 }
 0x59f   :  { %1682 = vmatpush3.bf16.msra.mxu1 %v1681_v46 }
 0x5a0   :  { %1683 = vmatprep.subr.bf16.mxu1 %v1770_v0 }
 0x5a3   :  { %1685 = vmatpush3.bf16.msra.mxu1 %v1684_v48 }
 0x5a4   :  { %1686 = vmatprep.subr.bf16.mxu1 %v1770_v0 }
 0x5a7   :  { %1688 = vmatpush3.bf16.msra.mxu1 %v1687_v56 }
 0x5a8   :  { %1689 = vmatprep.subr.bf16.mxu1 %v1770_v0 }
 0x5ab   :  { %1691 = vmatpush3.bf16.msra.mxu1 %v1690_v60 }
 0x5ac   :  { %1692 = vmatprep.subr.bf16.mxu1 %v1770_v0  ;;  %v910_v0 = vld [vmem:[%s2119_s5] ss:$0 sm:$0xff] }
 0x5af   :  { %1694 = vmatpush3.bf16.msra.mxu1 %v1693_v63 }
 0x665   :  { %v724_v50 = vpop.f32.mrb[6].mxu1 }
 0x666   :  { %v728_v51 = vadd.f32 %v724_v50, %v181_v49  ;;  %v1376_v52 = vpop.f32.mrb[7].mxu1 }
 0x668   :  { %1714 = vtanh.f32 %v728_v51 }
 0x672   :  { %v1715_v53 = vpop.eup %1714 }
 0x673   :  { %1410 = vmatmul.mubr.f32.vlgmr.msra.gmra.mrb[14].mxu0 %v1715_v53 }
 0x746   :  { %v798_v3 = vpop.f32.mrb[14].mxu0 }
 0x747   :  { %v802_v4 = vadd.f32 %v798_v3, %v186_v2  ;;  %v1411_v5 = vpop.f32.mrb[15].mxu0 }
 0x749   :  { %1716 = vtanh.f32 %v802_v4 }
 0x753   :  { %v1717_v6 = vpop.eup %1716 }
 0x754   :  { %804 = vst [vmem:[%s2121_s7] sm:$0xff] %v1717_v6  ;;  %1445 = vmatmul.mubr.f32.vlgmr.msra.gmra.mrb[8].mxu1 %v1717_v6 }
 0x827   :  { %v894_v7 = vpop.f32.mrb[8].mxu1 }
 0x828   :  { %v895_v10 = vadd.f32 %v910_v0, %v894_v7  ;;  %v1446_v11 = vpop.f32.mrb[9].mxu1 }
 0x82a   :  { %898 = vst [vmem:[%s2120_s6] sm:$0xff] %v895_v10 }
 0x82b   :  { %907 = vsyncpa [#allocation4], 1 }
 0x82c   :  { %908 = vsyncpa [#allocation6], 1 }

</bundles_post_ra>
